<compile_context>
chip_gen: v5e
topology: v5e:2x2
jax: 0.10.0
libtpu: 0.0.40
codegen_flags: <defaults>
</compile_context>

<pallas_src>
import jax
import jax.numpy as jnp
import numpy as np
from jax.experimental import pallas as pl
from jax.experimental.pallas import tpu as pltpu

EPS = 1e-5  # BatchNorm2d default eps


def _pick_tile(total, target, step):
    """Largest t <= min(total, target) with t % step == 0 and total % t == 0.

    Falls back to the full extent (always a legal block) if no divisor exists.
    """
    if total <= target:
        return total
    t = (target // step) * step
    while t >= step:
        if total % t == 0:
            return t
        t -= step
    return total


def _conv_stats_kernel(taps_ref, w_ref, y_ref, sum_ref, sq_ref):
    # taps_ref: (tm, 9*Cin) bf16    im2col rows for this tile
    # w_ref   : (9*Cin, Cout) bf16  folded conv weights
    # y_ref   : (tm, Cout) f32      conv output (bias-free; BN mean cancels it)
    # sum_ref, sq_ref: (1, 1, Cout) f32  per-tile partial BN statistics
    acc = jnp.dot(taps_ref[...], w_ref[...], preferred_element_type=jnp.float32)
    y_ref[...] = acc
    sum_ref[...] = jnp.sum(acc, axis=0, keepdims=True)[None]
    sq_ref[...] = jnp.sum(acc * acc, axis=0, keepdims=True)[None]


def _bn_relu_pool_kernel(y_ref, scale_ref, bias_ref, o_ref):
    # y_ref     : (tr, 2, W//2, 2*Cout) f32  conv output; dim 1 is the h pair,
    #             last dim packs (w-even | w-odd) channels on the lane dim
    # scale/bias: (1, 2*Cout) f32  folded BN scale/bias (duplicated per w half)
    # o_ref     : (tr, W//2, Cout) f32  pooled output
    cout = o_ref.shape[-1]
    y = y_ref[...] * scale_ref[...] + bias_ref[...]          # BN apply (FMA)
    rows = jnp.maximum(y[:, 0], y[:, 1])                     # pool over h pair
    cols = jnp.maximum(rows[..., :cout], rows[..., cout:])   # pool over w pair
    o_ref[...] = jnp.maximum(cols, 0.0)                      # ReLU (commutes with max)


def conv_block_forward(x_nchw, conv_w, conv_b, gamma, beta):
    """ConvBlock forward. x: (N, Cin, H, W) f32 -> (N, Cout, H//2, W//2) f32."""
    del conv_b  # exactly cancelled by the BatchNorm mean subtraction
    N, Cin, H, W = x_nchw.shape
    Cout = conv_w.shape[0]
    assert H % 2 == 0 and W % 2 == 0
    M = N * H * W
    K = 9 * Cin

    # ---- glue: NCHW -> NHWC (bf16), pad once, build streamed im2col (M, 9*Cin) ----
    # TODO(synk): replace the materialized im2col with halo'd row-band tiles built
    # in VMEM per grid step to cut the input HBM traffic by ~9x.
    x = jnp.transpose(x_nchw, (0, 2, 3, 1)).astype(jnp.bfloat16)
    xp = jnp.pad(x, ((0, 0), (1, 1), (1, 1), (0, 0)))
    taps = jnp.concatenate(
        [xp[:, kh:kh + H, kw:kw + W, :].reshape(M, Cin)
         for kh in range(3) for kw in range(3)], axis=1)             # (M, K)
    w9 = (jnp.transpose(conv_w, (2, 3, 1, 0))
          .reshape(K, Cout).astype(jnp.bfloat16))                    # (K, Cout)

    # ---- pass 1: conv matmul + partial BN stats, tiled & pipelined over M ----
    tm = _pick_tile(M, 256, 8)          # re-derive per generation for big shapes
    n_tiles = M // tm
    y_flat, psum, psq = pl.pallas_call(
        _conv_stats_kernel,
        out_shape=(jax.ShapeDtypeStruct((M, Cout), jnp.float32),
                   jax.ShapeDtypeStruct((n_tiles, 1, Cout), jnp.float32),
                   jax.ShapeDtypeStruct((n_tiles, 1, Cout), jnp.float32)),
        grid=(n_tiles,),
        in_specs=[pl.BlockSpec((tm, K), lambda i: (i, 0)),
                  pl.BlockSpec((K, Cout), lambda i: (0, 0))],
        out_specs=(pl.BlockSpec((tm, Cout), lambda i: (i, 0)),
                   pl.BlockSpec((1, 1, Cout), lambda i: (i, 0, 0)),
                   pl.BlockSpec((1, 1, Cout), lambda i: (i, 0, 0))),
        compiler_params=pltpu.CompilerParams(
            dimension_semantics=("parallel",)),
        cost_estimate=pl.CostEstimate(
            flops=2 * M * K * Cout, transcendentals=0,
            bytes_accessed=taps.size * 2 + w9.size * 2 + M * Cout * 4),
    )(taps, w9)

    # ---- tiny global stats reduction + BN folding (per-channel, plain XLA) ----
    mean = jnp.sum(psum, axis=(0, 1)) / M
    var = jnp.maximum(jnp.sum(psq, axis=(0, 1)) / M - mean * mean, 0.0)
    scale = gamma.astype(jnp.float32) * jax.lax.rsqrt(var + EPS)
    bias = beta.astype(jnp.float32) - mean * scale
    scale2 = jnp.tile(scale, 2).reshape(1, 2 * Cout)   # duplicated for w-even|w-odd
    bias2 = jnp.tile(bias, 2).reshape(1, 2 * Cout)

    # ---- pass 2: fused BN apply + ReLU + 2x2 max-pool, tiled over row pairs ----
    H2, W2 = H // 2, W // 2
    NH2 = N * H2
    # Free, contiguous row-major view: (N*H, W*Cout) -> (N*H/2, 2, W/2, 2*Cout)
    y4 = y_flat.reshape(NH2, 2, W2, 2 * Cout)
    tr = _pick_tile(NH2, 8, 1)
    pooled = pl.pallas_call(
        _bn_relu_pool_kernel,
        out_shape=jax.ShapeDtypeStruct((NH2, W2, Cout), jnp.float32),
        grid=(NH2 // tr,),
        in_specs=[pl.BlockSpec((tr, 2, W2, 2 * Cout), lambda i: (i, 0, 0, 0)),
                  pl.BlockSpec((1, 2 * Cout), lambda i: (0, 0)),
                  pl.BlockSpec((1, 2 * Cout), lambda i: (0, 0))],
        out_specs=pl.BlockSpec((tr, W2, Cout), lambda i: (i, 0, 0)),
        compiler_params=pltpu.CompilerParams(
            dimension_semantics=("parallel",)),
        cost_estimate=pl.CostEstimate(
            flops=4 * NH2 * 2 * W2 * 2 * Cout, transcendentals=0,
            bytes_accessed=y_flat.size * 4 + NH2 * W2 * Cout * 4),
    )(y4, scale2, bias2)

    # NOTE: with Cout < 128 (test shapes) the pooled stores are inherently
    # lane-sparse; for production channel counts (>=128) the last dim is lane-dense.
    out = pooled.reshape(N, H2, W2, Cout)
    return jnp.transpose(out, (0, 3, 1, 2))  # back to NCHW


def _reference(x_nchw, conv_w, conv_b, gamma, beta):
    """Pure-JAX f32 reference matching the PyTorch forward exactly."""
    y = jax.lax.conv_general_dilated(
        x_nchw, conv_w, window_strides=(1, 1), padding=((1, 1), (1, 1)),
        dimension_numbers=('NCHW', 'OIHW', 'NCHW'))
    y = y + conv_b.reshape(1, -1, 1, 1)
    mean = jnp.mean(y, axis=(0, 2, 3), keepdims=True)
    var = jnp.mean((y - mean) ** 2, axis=(0, 2, 3), keepdims=True)
    y = (y - mean) * jax.lax.rsqrt(var + EPS)
    y = y * gamma.reshape(1, -1, 1, 1) + beta.reshape(1, -1, 1, 1)
    y = jnp.maximum(y, 0.0)
    N, C, H, W = y.shape
    return y.reshape(N, C, H // 2, 2, W // 2, 2).max(axis=(3, 5))


if __name__ == "__main__":
    N, Cin, H, W, Cout = 2, 4, 16, 16, 8

    key = jax.random.PRNGKey(0)
    k1, k2, k3, k4, k5 = jax.random.split(key, 5)
    x = jax.random.normal(k1, (N, Cin, H, W), jnp.float32)
    conv_w = 0.1 * jax.random.normal(k2, (Cout, Cin, 3, 3), jnp.float32)
    conv_b = 0.1 * jax.random.normal(k3, (Cout,), jnp.float32)
    gamma = 1.0 + 0.1 * jax.random.normal(k4, (Cout,), jnp.float32)
    beta = 0.1 * jax.random.normal(k5, (Cout,), jnp.float32)

    fwd = jax.jit(conv_block_forward)
    out = jax.block_until_ready(fwd(x, conv_w, conv_b, gamma, beta))

    ref = _reference(x, conv_w, conv_b, gamma, beta)
    assert out.shape == (N, Cout, H // 2, W // 2)
    # bf16 matmul operands (f32 accumulation) -> slightly looser tolerance.
    np.testing.assert_allclose(np.asarray(out), np.asarray(ref),
                               rtol=2e-2, atol=2e-2)
    print("KERNEL_OK")
</pallas_src>

<mosaic_0001>
module attributes {stable_mosaic.version = 11 : i64} {
  func.func @_conv_stats_kernel(%arg0: i32, %arg1: memref<256x36xbf16, #tpu.memory_space<vmem>>, %arg2: memref<36x8xbf16, #tpu.memory_space<vmem>>, %arg3: memref<256x8xf32, #tpu.memory_space<vmem>>, %arg4: memref<1x1x8xf32, #tpu.memory_space<vmem>>, %arg5: memref<1x1x8xf32, #tpu.memory_space<vmem>>) attributes {dimension_semantics = [#tpu.dimension_semantics<parallel>], iteration_bounds = array<i64: 2>, scalar_prefetch = 0 : i64, scratch_operands = 0 : i64, tpu.core_type = #tpu.core_type<tc>, window_params = [{transform_indices = @transform_0, window_bounds = array<i64: 256, 36>}, {pipeline_mode = #tpu.pipeline_mode<synchronous>, transform_indices = @transform_1, window_bounds = array<i64: 36, 8>}, {transform_indices = @transform_2, window_bounds = array<i64: 256, 8>}, {transform_indices = @transform_3, window_bounds = array<i64: 1, 1, 8>}, {transform_indices = @transform_4, window_bounds = array<i64: 1, 1, 8>}]} {
    %c0 = arith.constant 0 : index
    %c0_0 = arith.constant 0 : index
    %0 = vector.load %arg1[%c0, %c0_0] : memref<256x36xbf16, #tpu.memory_space<vmem>>, vector<256x36xbf16>
    %c0_1 = arith.constant 0 : index
    %c0_2 = arith.constant 0 : index
    %1 = vector.load %arg2[%c0_1, %c0_2] : memref<36x8xbf16, #tpu.memory_space<vmem>>, vector<36x8xbf16>
    %cst = arith.constant dense<0.000000e+00> : vector<256x8xf32>
    %2 = tpu.matmul %0, %1, %cst {dimension_numbers = #tpu.dot_dimension_numbers<[1], [0], [0], [1], [0, 0, 1, 1], [], []>} : vector<256x36xbf16>, vector<36x8xbf16>, vector<256x8xf32> -> vector<256x8xf32>
    %c0_3 = arith.constant 0 : index
    %c0_4 = arith.constant 0 : index
    %3 = vector.load %arg3[%c0_3, %c0_4] : memref<256x8xf32, #tpu.memory_space<vmem>>, vector<256x8xf32>
    tpu.vector_store %arg3[%c0_3, %c0_4], %2 {strides = array<i32>} : memref<256x8xf32, #tpu.memory_space<vmem>>, vector<256x8xf32>,
    %cst_5 = arith.constant dense<0.000000e+00> : vector<8xf32>
    %4 = vector.multi_reduction <add>, %2, %cst_5 [0] : vector<256x8xf32> to vector<8xf32>
    %5 = vector.shape_cast %4 : vector<8xf32> to vector<1x8xf32>
    %6 = vector.shape_cast %5 : vector<1x8xf32> to vector<1x1x8xf32>
    %c0_6 = arith.constant 0 : index
    %c0_7 = arith.constant 0 : index
    %c0_8 = arith.constant 0 : index
    %7 = vector.load %arg4[%c0_6, %c0_7, %c0_8] : memref<1x1x8xf32, #tpu.memory_space<vmem>>, vector<1x1x8xf32>
    tpu.vector_store %arg4[%c0_6, %c0_7, %c0_8], %6 {strides = array<i32>} : memref<1x1x8xf32, #tpu.memory_space<vmem>>, vector<1x1x8xf32>,
    %8 = arith.mulf %2, %2 : vector<256x8xf32>
    %cst_9 = arith.constant dense<0.000000e+00> : vector<8xf32>
    %9 = vector.multi_reduction <add>, %8, %cst_9 [0] : vector<256x8xf32> to vector<8xf32>
    %10 = vector.shape_cast %9 : vector<8xf32> to vector<1x8xf32>
    %11 = vector.shape_cast %10 : vector<1x8xf32> to vector<1x1x8xf32>
    %c0_10 = arith.constant 0 : index
    %c0_11 = arith.constant 0 : index
    %c0_12 = arith.constant 0 : index
    %12 = vector.load %arg5[%c0_10, %c0_11, %c0_12] : memref<1x1x8xf32, #tpu.memory_space<vmem>>, vector<1x1x8xf32>
    tpu.vector_store %arg5[%c0_10, %c0_11, %c0_12], %11 {strides = array<i32>} : memref<1x1x8xf32, #tpu.memory_space<vmem>>, vector<1x1x8xf32>,
    return
  }
  func.func @transform_0(%arg0: i32) -> (i32, i32) {
    %c0_i32 = arith.constant 0 : i32
    %c0_i32_0 = arith.constant 0 : i32
    return %arg0, %c0_i32 : i32, i32
  }
  func.func @transform_1(%arg0: i32) -> (i32, i32) {
    %c0_i32 = arith.constant 0 : i32
    %c0_i32_0 = arith.constant 0 : i32
    %c0_i32_1 = arith.constant 0 : i32
    return %c0_i32, %c0_i32_0 : i32, i32
  }
  func.func @transform_2(%arg0: i32) -> (i32, i32) {
    %c0_i32 = arith.constant 0 : i32
    %c0_i32_0 = arith.constant 0 : i32
    return %arg0, %c0_i32 : i32, i32
  }
  func.func @transform_3(%arg0: i32) -> (i32, i32, i32) {
    %c0_i32 = arith.constant 0 : i32
    %c0_i32_0 = arith.constant 0 : i32
    %c0_i32_1 = arith.constant 0 : i32
    return %arg0, %c0_i32, %c0_i32_0 : i32, i32, i32
  }
  func.func @transform_4(%arg0: i32) -> (i32, i32, i32) {
    %c0_i32 = arith.constant 0 : i32
    %c0_i32_0 = arith.constant 0 : i32
    %c0_i32_1 = arith.constant 0 : i32
    return %arg0, %c0_i32, %c0_i32_0 : i32, i32, i32
  }
}

module attributes {stable_mosaic.version = 11 : i64} {
  func.func @_bn_relu_pool_kernel(%arg0: i32, %arg1: memref<8x2x8x16xf32, #tpu.memory_space<vmem>>, %arg2: memref<1x16xf32, #tpu.memory_space<vmem>>, %arg3: memref<1x16xf32, #tpu.memory_space<vmem>>, %arg4: memref<8x8x8xf32, #tpu.memory_space<vmem>>) attributes {dimension_semantics = [#tpu.dimension_semantics<parallel>], iteration_bounds = array<i64: 2>, scalar_prefetch = 0 : i64, scratch_operands = 0 : i64, tpu.core_type = #tpu.core_type<tc>, window_params = [{transform_indices = @transform_0, window_bounds = array<i64: 8, 2, 8, 16>}, {pipeline_mode = #tpu.pipeline_mode<synchronous>, transform_indices = @transform_1, window_bounds = array<i64: 1, 16>}, {pipeline_mode = #tpu.pipeline_mode<synchronous>, transform_indices = @transform_2, window_bounds = array<i64: 1, 16>}, {transform_indices = @transform_3, window_bounds = array<i64: 8, 8, 8>}]} {
    %c0 = arith.constant 0 : index
    %c0_0 = arith.constant 0 : index
    %c0_1 = arith.constant 0 : index
    %c0_2 = arith.constant 0 : index
    %0 = vector.load %arg1[%c0, %c0_0, %c0_1, %c0_2] : memref<8x2x8x16xf32, #tpu.memory_space<vmem>>, vector<8x2x8x16xf32>
    %c0_3 = arith.constant 0 : index
    %c0_4 = arith.constant 0 : index
    %1 = vector.load %arg2[%c0_3, %c0_4] : memref<1x16xf32, #tpu.memory_space<vmem>>, vector<1x16xf32>
    %2 = vector.shape_cast %1 : vector<1x16xf32> to vector<1x1x1x16xf32>
    %3 = vector.broadcast %2 : vector<1x1x1x16xf32> to vector<8x2x8x16xf32>
    %4 = arith.mulf %0, %3 : vector<8x2x8x16xf32>
    %c0_5 = arith.constant 0 : index
    %c0_6 = arith.constant 0 : index
    %5 = vector.load %arg3[%c0_5, %c0_6] : memref<1x16xf32, #tpu.memory_space<vmem>>, vector<1x16xf32>
    %6 = vector.shape_cast %5 : vector<1x16xf32> to vector<1x1x1x16xf32>
    %7 = vector.broadcast %6 : vector<1x1x1x16xf32> to vector<8x2x8x16xf32>
    %8 = arith.addf %4, %7 : vector<8x2x8x16xf32>
    %9 = vector.extract_strided_slice %8 {offsets = [0, 0, 0, 0], sizes = [8, 1, 8, 16], strides = [1, 1, 1, 1]} : vector<8x2x8x16xf32> to vector<8x1x8x16xf32>
    %10 = vector.shape_cast %9 : vector<8x1x8x16xf32> to vector<8x8x16xf32>
    %11 = vector.extract_strided_slice %8 {offsets = [0, 1, 0, 0], sizes = [8, 1, 8, 16], strides = [1, 1, 1, 1]} : vector<8x2x8x16xf32> to vector<8x1x8x16xf32>
    %12 = vector.shape_cast %11 : vector<8x1x8x16xf32> to vector<8x8x16xf32>
    %13 = arith.maximumf %10, %12 : vector<8x8x16xf32>
    %14 = vector.extract_strided_slice %13 {offsets = [0, 0, 0], sizes = [8, 8, 8], strides = [1, 1, 1]} : vector<8x8x16xf32> to vector<8x8x8xf32>
    %15 = vector.extract_strided_slice %13 {offsets = [0, 0, 8], sizes = [8, 8, 8], strides = [1, 1, 1]} : vector<8x8x16xf32> to vector<8x8x8xf32>
    %16 = arith.maximumf %14, %15 : vector<8x8x8xf32>
    %cst = arith.constant 0.000000e+00 : f32
    %17 = vector.broadcast %cst : f32 to vector<8x8x8xf32>
    %18 = arith.maximumf %16, %17 : vector<8x8x8xf32>
    %c0_7 = arith.constant 0 : index
    %c0_8 = arith.constant 0 : index
    %c0_9 = arith.constant 0 : index
    %19 = vector.load %arg4[%c0_7, %c0_8, %c0_9] : memref<8x8x8xf32, #tpu.memory_space<vmem>>, vector<8x8x8xf32>
    tpu.vector_store %arg4[%c0_7, %c0_8, %c0_9], %18 {strides = array<i32>} : memref<8x8x8xf32, #tpu.memory_space<vmem>>, vector<8x8x8xf32>,
    return
  }
  func.func @transform_0(%arg0: i32) -> (i32, i32, i32, i32) {
    %c0_i32 = arith.constant 0 : i32
    %c0_i32_0 = arith.constant 0 : i32
    %c0_i32_1 = arith.constant 0 : i32
    %c0_i32_2 = arith.constant 0 : i32
    return %arg0, %c0_i32, %c0_i32_0, %c0_i32_1 : i32, i32, i32, i32
  }
  func.func @transform_1(%arg0: i32) -> (i32, i32) {
    %c0_i32 = arith.constant 0 : i32
    %c0_i32_0 = arith.constant 0 : i32
    %c0_i32_1 = arith.constant 0 : i32
    return %c0_i32, %c0_i32_0 : i32, i32
  }
  func.func @transform_2(%arg0: i32) -> (i32, i32) {
    %c0_i32 = arith.constant 0 : i32
    %c0_i32_0 = arith.constant 0 : i32
    %c0_i32_1 = arith.constant 0 : i32
    return %c0_i32, %c0_i32_0 : i32, i32
  }
  func.func @transform_3(%arg0: i32) -> (i32, i32, i32) {
    %c0_i32 = arith.constant 0 : i32
    %c0_i32_0 = arith.constant 0 : i32
    %c0_i32_1 = arith.constant 0 : i32
    return %arg0, %c0_i32, %c0_i32_0 : i32, i32, i32
  }
}

</mosaic_0001>

<bundles_post_ra>
// kernel: tile.18
= control target key start
LH: loop header
LB: loop body
LE: loop exit
PB: predicated region body
PF: predicated region fallthrough
CT: control target
= control target key end

     0   :  { %s22_s0 = inlined_call_operand.vmem [shape: f32[8], index: 0, kind: input, shape index: {}]   ;;  %s23_s1 = inlined_call_operand.vmem [shape: f32[2,8], index: 1, kind: output, shape index: {}]  }
   0x1   :  { %v4_v0 = vld [vmem:[%s22_s0] ss:$0 sm:$0xff] }
   0x2   :  { %5 = vst [vmem:[%s23_s1] sm:$0x3] %v4_v0 }

// kernel: tile.19
= control target key start
LH: loop header
LB: loop body
LE: loop exit
PB: predicated region body
PF: predicated region fallthrough
CT: control target
= control target key end

     0   :  { %vm7_vm0 = vcmask 64512   ;;  %vm13_vm1 = vcmask 130112   ;;  %s39_s0 = inlined_call_operand.vmem [shape: f32[2,8], index: 0, kind: input, shape index: {}]   ;;  %s40_s1 = inlined_call_operand.vmem [shape: f32[1,16], index: 1, kind: output, shape index: {}]  }
   0x1   :  { %v4_v0 = vld [vmem:[%s39_s0] sm:$0x3]  ;;  %s22_s0 = smov 8  }
   0x2   :  { %5 = vst [vmem:[#allocation1] sm:$0x3] %v4_v0 }
   0x9   :  { %v10_v1 = vld [vmem:[#allocation1 + $0x1] sm:$0x1]   ;;  %v6_v2 = vld [vmem:[#allocation1] sm:$0x1]  }
   0xa   :  { %11 = vrot.lane.b32.xlu0 %v10_v1, %s22_s0  ;;  %8 = vst.msk [vmem:[#allocation0] sm:$0x1] %vm7_vm0, %v6_v2  }
  0x7c   :  { %v12_v3 = vpop.permute.xlu0 %11  }
  0x7d   :  { %14 = vst.msk [vmem:[#allocation0] sm:$0x1] %vm13_vm1, %v12_v3  }
  0x84   :  { %v17_v4 = vld [vmem:[#allocation0] sm:$0x1] }
  0x85   :  { %20 = vst [vmem:[%s40_s1] sm:$0x1] %v17_v4 }

// kernel: conv_block_forward.3
= control target key start
LH: loop header
LB: loop body
LE: loop exit
PB: predicated region body
PF: predicated region fallthrough
CT: control target
= control target key end

     0   :  { %s407_s12 = smov 0   ;;  %s468_s0 = inlined_call_operand.vmem [shape: f32[16,2,8,16], index: 0, kind: input, shape index: {}]   ;;  %s469_s1 = inlined_call_operand.vmem [shape: f32[1,16], index: 1, kind: input, shape index: {}]   ;;  %s470_s2 = inlined_call_operand.vmem [shape: f32[1,16], index: 2, kind: input, shape index: {}]   ;;  %s471_s3 = inlined_call_operand.vmem [shape: f32[16,8,8], index: 3, kind: output, shape index: {}]  }
   0x1 LB: > { %s354_s13 = sadd.s32 4294967295, %s384_s12   ;;  %p358_p0 = scmp.ge.s32.totalorder %s384_s12, 1  ;;  %s384_s12 = sphi %s407_s12, %s13_s12  }
   0x2   : > { %p139_p1 = scmp.lt.s32.totalorder %s384_s12, 3 }
   0x4   : > { %p140_p2 = pnand %p358_p0, %p139_p1 }
   0x5   : > { %s359_s14 = sshll.u32 (!%p140_p2), %s354_s13, 3  ;;  %s386_s23 = smov (!%p140_p2), 120  }
   0x6   : > { %143 = sbr.rel (%p140_p2) target bundleno = 158 (0x9e), region = 32  ;;  %p165_p3 = scmp.lt.s32.totalorder (!%p140_p2), %s359_s14, 15 }
   0xb   : > { %s473_s14 = smov (!%p165_p3, %s359_s14), 15  ;;  %v376_v0 = vld [vmem:[%s469_s1] ss:$0 sm:$0xff]  ;;  %vm289_vm0 = vcmask 64512  }
   0xc   : > { %s366_s17 = sshll.u32 %s473_s14, 4  ;;  %v377_v1 = vld [vmem:[%s470_s2] ss:$0 sm:$0xff]  ;;  %s363_s24 = sshll.u32 %s473_s14, 3 }
   0xd   : > { %s424_s20 = scalar_lea.vmem %s468_s0, %s366_s17  ;;  %s175_s27 = scalar_lea.vmem %s471_s3, %s363_s24 }
   0xe   : > { %v181_v2 = vld [vmem:[%s424_s20 + $0x20] sm:$0xff]  ;;  %v182_v3 = vld [vmem:[%s424_s20 + $0x28] sm:$0xff]  ;;  %v183_v9 = vld [vmem:[%s424_s20 + $0x30] sm:$0xff] }
   0xf   : > { %v177_v4 = vld [vmem:[%s424_s20] sm:$0xff]  ;;  %v201_v5 = vmul.f32 %v376_v0, %v181_v2  ;;  %v202_v6 = vmul.f32 %v376_v0, %v182_v3  ;;  %v178_v7 = vld [vmem:[%s424_s20 + $0x8] sm:$0xff]  ;;  %v184_v10 = vld [vmem:[%s424_s20 + $0x38] sm:$0xff]  ;;  %v203_v12 = vmul.f32 %v376_v0, %v183_v9 }
  0x10   : > { %v197_v8 = vmul.f32 %v376_v0, %v177_v4  ;;  %v198_v11 = vmul.f32 %v376_v0, %v178_v7  ;;  %v179_v13 = vld [vmem:[%s424_s20 + $0x10] sm:$0xff]  ;;  %v180_v14 = vld [vmem:[%s424_s20 + $0x18] sm:$0xff]  ;;  %v204_v18 = vmul.f32 %v376_v0, %v184_v10  ;;  %v185_v22 = vld [vmem:[%s424_s20 + $0x40] sm:$0xff] }
  0x11   : > { %v221_v15 = vadd.f32 %v377_v1, %v201_v5  ;;  %v222_v16 = vadd.f32 %v377_v1, %v202_v6  ;;  %v199_v20 = vmul.f32 %v376_v0, %v179_v13  ;;  %v200_v21 = vmul.f32 %v376_v0, %v180_v14  ;;  %v186_v24 = vld [vmem:[%s424_s20 + $0x48] sm:$0xff]  ;;  %v187_v29 = vld [vmem:[%s424_s20 + $0x50] sm:$0xff]  ;;  %v188_v30 = vld [vmem:[%s424_s20 + $0x58] sm:$0xff] }
  0x12   : > { %v217_v17 = vadd.f32 %v377_v1, %v197_v8  ;;  %v218_v19 = vadd.f32 %v377_v1, %v198_v11  ;;  %v223_v26 = vadd.f32 %v377_v1, %v203_v12  ;;  %v224_v27 = vadd.f32 %v377_v1, %v204_v18  ;;  %v191_v33 = vld [vmem:[%s424_s20 + $0x70] sm:$0xff]  ;;  %v192_v34 = vld [vmem:[%s424_s20 + $0x78] sm:$0xff]  ;;  %v189_v36 = vld [vmem:[%s424_s20 + $0x60] sm:$0xff] }
  0x13   : > { %v235_v23 = vmax.f32 %v221_v15, %v222_v16  ;;  %v205_v28 = vmul.f32 %v376_v0, %v185_v22  ;;  %v219_v31 = vadd.f32 %v377_v1, %v199_v20  ;;  %v220_v32 = vadd.f32 %v377_v1, %v200_v21  ;;  %v190_v37 = vld [vmem:[%s424_s20 + $0x68] sm:$0xff] }
  0x14   : > { %v233_v25 = vmax.f32 %v217_v17, %v218_v19  ;;  %v206_v35 = vmul.f32 %v376_v0, %v186_v24  ;;  %v207_v40 = vmul.f32 %v376_v0, %v187_v29  ;;  %v208_v41 = vmul.f32 %v376_v0, %v188_v30 }
  0x15   : > { %253 = vrot.lane.b32.xlu1 %v235_v23, %s386_s23  ;;  %v225_v38 = vadd.f32 %v377_v1, %v205_v28  ;;  %v236_v42 = vmax.f32 %v223_v26, %v224_v27  ;;  %v211_v43 = vmul.f32 %v376_v0, %v191_v33  ;;  %v212_v44 = vmul.f32 %v376_v0, %v192_v34 }
  0x16   : > { %249 = vrot.lane.b32.xlu0 %v233_v25, %s386_s23  ;;  %v226_v39 = vadd.f32 %v377_v1, %v206_v35  ;;  %v234_v45 = vmax.f32 %v219_v31, %v220_v32  ;;  %v209_v46 = vmul.f32 %v376_v0, %v189_v36  ;;  %v210_v47 = vmul.f32 %v376_v0, %v190_v37 }
  0x17   : > { %v227_v49 = vadd.f32 %v377_v1, %v207_v40  ;;  %v228_v50 = vadd.f32 %v377_v1, %v208_v41  ;;  %v231_v51 = vadd.f32 %v377_v1, %v211_v43  ;;  %v232_v52 = vadd.f32 %v377_v1, %v212_v44 }
  0x18   : > { %v237_v48 = vmax.f32 %v225_v38, %v226_v39  ;;  %v229_v53 = vadd.f32 %v377_v1, %v209_v46  ;;  %v230_v54 = vadd.f32 %v377_v1, %v210_v47 }
  0x19   : > { %v238_v55 = vmax.f32 %v227_v49, %v228_v50  ;;  %v240_v56 = vmax.f32 %v231_v51, %v232_v52 }
  0x1a   : > { %257 = vrot.lane.b32.xlu2 %v237_v48, %s386_s23  ;;  %v239_v57 = vmax.f32 %v229_v53, %v230_v54 }
  0x1d   : > { %255 = vrot.lane.b32.xlu1 %v236_v42, %s386_s23 }
  0x1e   : > { %251 = vrot.lane.b32.xlu0 %v234_v45, %s386_s23 }
  0x22   : > { %259 = vrot.lane.b32.xlu2 %v238_v55, %s386_s23 }
  0x25   : > { %263 = vrot.lane.b32.xlu1 %v240_v56, %s386_s23 }
  0x26   : > { %261 = vrot.lane.b32.xlu0 %v239_v57, %s386_s23 }
  0x74   : > { %v258_v58 = vpop.permute.xlu2 %257 }
  0x75   : > { %v277_v59 = vmax.f32 %v237_v48, %v258_v58 }
  0x77   : > { %v285_v60 = vmax.f32 %v277_v59, 0.0 }
  0x79   : > { %294 = vst.msk [vmem:[%s175_s27 + $0x20] sm:$0xff] %vm289_vm0, %v285_v60 }
  0x7c   : > { %v260_v61 = vpop.permute.xlu2 %259 }
  0x7d   : > { %v278_v62 = vmax.f32 %v238_v55, %v260_v61 }
  0x7f   : > { %v286_v63 = vmax.f32 %v278_v62, 0.0 }
  0x81   : > { %295 = vst.msk [vmem:[%s175_s27 + $0x28] sm:$0xff] %vm289_vm0, %v286_v63 }
  0x87   : > { %v254_v0 = vpop.permute.xlu1 %253 }
  0x88   : > { %v275_v1 = vmax.f32 %v235_v23, %v254_v0  ;;  %v250_v2 = vpop.permute.xlu0 %249 }
  0x89   : > { %v273_v3 = vmax.f32 %v233_v25, %v250_v2 }
  0x8a   : > { %v283_v4 = vmax.f32 %v275_v1, 0.0 }
  0x8b   : > { %v281_v5 = vmax.f32 %v273_v3, 0.0 }
  0x8c   : > { %292 = vst.msk [vmem:[%s175_s27 + $0x10] sm:$0xff] %vm289_vm0, %v283_v4 }
  0x8d   : > { %290 = vst.msk [vmem:[%s175_s27] sm:$0xff] %vm289_vm0, %v281_v5 }
  0x8f   : > { %v256_v6 = vpop.permute.xlu1 %255 }
  0x90   : > { %v276_v7 = vmax.f32 %v236_v42, %v256_v6  ;;  %v252_v8 = vpop.permute.xlu0 %251 }
  0x91   : > { %v274_v9 = vmax.f32 %v234_v45, %v252_v8 }
  0x92   : > { %v284_v10 = vmax.f32 %v276_v7, 0.0 }
  0x93   : > { %v282_v11 = vmax.f32 %v274_v9, 0.0 }
  0x94   : > { %293 = vst.msk [vmem:[%s175_s27 + $0x18] sm:$0xff] %vm289_vm0, %v284_v10 }
  0x95   : > { %291 = vst.msk [vmem:[%s175_s27 + $0x8] sm:$0xff] %vm289_vm0, %v282_v11 }
  0x97   : > { %v264_v12 = vpop.permute.xlu1 %263 }
  0x98   : > { %v280_v13 = vmax.f32 %v240_v56, %v264_v12  ;;  %v262_v14 = vpop.permute.xlu0 %261 }
  0x99   : > { %v279_v15 = vmax.f32 %v239_v57, %v262_v14 }
  0x9a   : > { %v288_v16 = vmax.f32 %v280_v13, 0.0 }
  0x9b   : > { %v287_v17 = vmax.f32 %v279_v15, 0.0 }
  0x9c   : > { %297 = vst.msk [vmem:[%s175_s27 + $0x38] sm:$0xff] %vm289_vm0, %v288_v16 }
  0x9d   : > { %296 = vst.msk [vmem:[%s175_s27 + $0x30] sm:$0xff] %vm289_vm0, %v287_v17 }
  0x9e PF: > { %s13_s12 = sadd.s32 1, %s384_s12  }
  0x9f   : > { %p10_p4 = scmp.ge.s32.totalorder %s13_s12, 4  }
  0xa1   :  { %12 = sbr.rel (!%p10_p4) target bundleno = 1 (0x1), region = 62 }

// kernel: conv_block_forward.2
= control target key start
LH: loop header
LB: loop body
LE: loop exit
PB: predicated region body
PF: predicated region fallthrough
CT: control target
= control target key end

     0   :  { %s972_s15 = smov 0   ;;  %s1315_s0 = inlined_call_operand.vmem [shape: bf16[512,36], index: 0, kind: input, shape index: {}]   ;;  %s1316_s1 = inlined_call_operand.vmem [shape: bf16[36,8], index: 1, kind: input, shape index: {}]   ;;  %s1317_s2 = inlined_call_operand.vmem [shape: f32[512,8], index: 2, kind: output, shape index: {0}]   ;;  %s1318_s3 = inlined_call_operand.vmem [shape: f32[2,1,8], index: 3, kind: output, shape index: {1}]   ;;  %s1319_s4 = inlined_call_operand.vmem [shape: f32[2,1,8], index: 4, kind: output, shape index: {2}]  }
   0x1 LB: > { %s978_s16 = sadd.s32 4294967295, %s945_s15   ;;  %p809_p0 = scmp.ge.s32.totalorder %s945_s15, 1  ;;  %s945_s15 = sphi %s972_s15, %s15_s15  }
   0x2   : > { %p168_p1 = scmp.lt.s32.totalorder %s945_s15, 3 }
   0x4   : > { %p169_p2 = pnand %p809_p0, %p168_p1 }
   0x5   : > { %s810_s19 = sshll.u32 (!%p169_p2), %s978_s16, 5  ;;  %p212_p4 = scmp.lt.s32.totalorder (!%p169_p2), %s978_s16, 1 }
   0x6   : > { %172 = sbr.rel (%p169_p2) target bundleno = 276 (0x114), region = 28  ;;  %p201_p3 = scmp.lt.s32.totalorder (!%p169_p2), %s810_s19, 63 }
   0xb   : > { %v255_v0 = vld [vmem:[%s1316_s1 + $0x10] sm:$0x3]  ;;  %vm400_vm0 = vcmask 1041408   ;;  %s1321_s19 = smov (!%p201_p3, %s810_s19), 63  ;;  %v921_v4 = vld [vmem:[%s1316_s1 + $0x8] sm:$0xff]  ;;  %v920_v5 = vld [vmem:[%s1316_s1] sm:$0xff] }
   0xc   : > { %v345_v1 = vunpack.c.l.b16 %v255_v0  ;;  %s811_s22 = sshll.u32 %s1321_s19, 2  ;;  %vm351_vm1 = vcmask 293888   ;;  %s813_s28 = sshll.u32 %s1321_s19, 3  ;;  %vm493_vm2 = vcmask 64512   ;;  %vm595_vm3 = vcmask 57344  }
   0xd   : > { %s998_s27 = scalar_lea.vmem %s1315_s0, %s811_s22  ;;  %s1036_s5 = scalar_lea.vmem %s1317_s2, %s813_s28 }
   0xe   : > { %v348_v2 = vpack.c.b16 %v345_v1, %v345_v1  ;;  %v904_v6 = vld [vmem:[%s998_s27] sm:$0xff]  ;;  %v905_v10 = vld [vmem:[%s998_s27 + $0x8] sm:$0xff]  ;;  %v906_v14 = vld [vmem:[%s998_s27 + $0x10] sm:$0xff]  ;;  %s1323_s16 = smov (!%p212_p4, %s978_s16), 1 }
   0xf   : > { %v908_v7 = vld [vmem:[%s998_s27 + $0x20] sm:$0xff]  ;;  %v909_v11 = vld [vmem:[%s998_s27 + $0x28] sm:$0xff]  ;;  %v910_v15 = vld [vmem:[%s998_s27 + $0x30] sm:$0xff]  ;;  %s214_s8 = scalar_lea.vmem %s1318_s3, %s1323_s16  ;;  %s217_s11 = scalar_lea.vmem %s1319_s4, %s1323_s16 }
  0x10   : > { %v402_v3 = vsel %vm400_vm0, %v348_v2, 0  ;;  %v912_v8 = vld [vmem:[%s998_s27 + $0x40] sm:$0xff]  ;;  %v913_v12 = vld [vmem:[%s998_s27 + $0x48] sm:$0xff]  ;;  %v914_v16 = vld [vmem:[%s998_s27 + $0x50] sm:$0xff] }
  0x11   : > { %409 = vmatpush.bf16.msra.mxu0 %v402_v3  ;;  %922 = vmatpush.bf16.msra.mxu1 %v402_v3  ;;  %v916_v9 = vld [vmem:[%s998_s27 + $0x60] sm:$0xff]  ;;  %v917_v13 = vld [vmem:[%s998_s27 + $0x68] sm:$0xff]  ;;  %v918_v17 = vld [vmem:[%s998_s27 + $0x70] sm:$0xff] }
  0x12   : > { %923 = vmatpush.bf16.msra.mxu2 %v402_v3  ;;  %924 = vmatpush.bf16.msra.mxu3 %v402_v3  ;;  %v907_v18 = vld [vmem:[%s998_s27 + $0x18] sm:$0xff] }
  0x13   : > { %v911_v19 = vld [vmem:[%s998_s27 + $0x38] sm:$0xff] }
  0x14   : > { %v915_v20 = vld [vmem:[%s998_s27 + $0x58] sm:$0xff] }
  0x15   : > { %410 = vmatpush.bf16.msra.mxu0 %v921_v4  ;;  %925 = vmatpush.bf16.msra.mxu1 %v921_v4  ;;  %v919_v21 = vld [vmem:[%s998_s27 + $0x78] sm:$0xff] }
  0x16   : > { %926 = vmatpush.bf16.msra.mxu2 %v921_v4  ;;  %927 = vmatpush.bf16.msra.mxu3 %v921_v4 }
  0x19   : > { %411 = vmatpush.bf16.msra.mxu0 %v920_v5  ;;  %928 = vmatpush.bf16.msra.mxu1 %v920_v5 }
  0x1a   : > { %929 = vmatpush.bf16.msra.mxu2 %v920_v5  ;;  %930 = vmatpush.bf16.msra.mxu3 %v920_v5 }
  0x1c   : > { %886 = vmatmul.msk.bf16.vlgmr.msra.gmra.mxu0 %vm351_vm1, %v904_v6  ;;  %890 = vmatmul.msk.bf16.vlgmr.msra.gmra.mxu1 %vm351_vm1, %v908_v7 }
  0x1d   : > { %894 = vmatmul.msk.bf16.vlgmr.msra.gmra.mxu2 %vm351_vm1, %v912_v8  ;;  %898 = vmatmul.msk.bf16.vlgmr.msra.gmra.mxu3 %vm351_vm1, %v916_v9 }
  0x2c   : > { %887 = vmatmul.msk.bf16.gmra.mxu0 %vm351_vm1, %v905_v10  ;;  %891 = vmatmul.msk.bf16.gmra.mxu1 %vm351_vm1, %v909_v11 }
  0x2d   : > { %895 = vmatmul.msk.bf16.gmra.mxu2 %vm351_vm1, %v913_v12  ;;  %899 = vmatmul.msk.bf16.gmra.mxu3 %vm351_vm1, %v917_v13 }
  0x3c   : > { %888 = vmatmul.msk.bf16.gmra.mxu0 %vm351_vm1, %v906_v14  ;;  %892 = vmatmul.msk.bf16.gmra.mxu1 %vm351_vm1, %v910_v15 }
  0x3d   : > { %896 = vmatmul.msk.bf16.gmra.mxu2 %vm351_vm1, %v914_v16  ;;  %900 = vmatmul.msk.bf16.gmra.mxu3 %vm351_vm1, %v918_v17 }
  0x4c   : > { %889 = vmatmul.msk.bf16.gmra.mxu0 %vm351_vm1, %v907_v18  ;;  %893 = vmatmul.msk.bf16.gmra.mxu1 %vm351_vm1, %v911_v19 }
  0x4d   : > { %897 = vmatmul.msk.bf16.gmra.mxu2 %vm351_vm1, %v915_v20  ;;  %901 = vmatmul.msk.bf16.gmra.mxu3 %vm351_vm1, %v919_v21 }
  0x99   : > { %v413_v22 = vpop.f32.mrf.mxu0  ;;  %v1038_v23 = vpop.f32.mrf.mxu1 }
  0x9a   : > { %494 = vst.msk [vmem:[%s1036_s5] sm:$0xff] %vm493_vm2, %v413_v22  ;;  %v597_v45 = vmul.f32 %v413_v22, %v413_v22  ;;  %v526_v48 = vsel %vm493_vm2, %v413_v22, 0.0  ;;  %v605_v19 = vmul.f32 %v1038_v23, %v1038_v23 }
  0x9b   : > { %502 = vst.msk [vmem:[%s1036_s5 + $0x40] sm:$0xff] %vm493_vm2, %v1038_v23 }
  0x9c   : > { %v629_v53 = vsel %vm493_vm2, %v597_v45, 0.0 }
  0xa0   : > { %v1045_v24 = vpop.f32.mrf.mxu2  ;;  %v1054_v27 = vpop.f32.mrf.mxu3 }
  0xa1   : > { %v415_v25 = vpop.f32.mrf.mxu0  ;;  %v1047_v26 = vpop.f32.mrf.mxu1  ;;  %510 = vst.msk [vmem:[%s1036_s5 + $0x80] sm:$0xff] %vm493_vm2, %v1045_v24 }
  0xa2   : > { %495 = vst.msk [vmem:[%s1036_s5 + $0x8] sm:$0xff] %vm493_vm2, %v415_v25  ;;  %v598_v43 = vmul.f32 %v415_v25, %v415_v25  ;;  %v527_v46 = vsel %vm493_vm2, %v415_v25, 0.0 }
  0xa3   : > { %503 = vst.msk [vmem:[%s1036_s5 + $0x48] sm:$0xff] %vm493_vm2, %v1047_v26  ;;  %v528_v52 = vadd.f32 %v527_v46, %v526_v48  ;;  %v644_v46 = vsel %vm493_vm2, %v605_v19, 0.0 }
  0xa4   : > { %518 = vst.msk [vmem:[%s1036_s5 + $0xc0] sm:$0xff] %vm493_vm2, %v1054_v27  ;;  %v630_v49 = vsel %vm493_vm2, %v598_v43, 0.0 }
  0xa5   : > { %v631_v58 = vadd.f32 %v630_v49, %v629_v53 }
  0xa8   : > { %v1062_v28 = vpop.f32.mrf.mxu2  ;;  %v1071_v31 = vpop.f32.mrf.mxu3 }
  0xa9   : > { %v418_v29 = vpop.f32.mrf.mxu0  ;;  %v1064_v30 = vpop.f32.mrf.mxu1  ;;  %511 = vst.msk [vmem:[%s1036_s5 + $0x88] sm:$0xff] %vm493_vm2, %v1062_v28  ;;  %v614_v19 = vmul.f32 %v1062_v28, %v1062_v28 }
  0xaa   : > { %496 = vst.msk [vmem:[%s1036_s5 + $0x10] sm:$0xff] %vm493_vm2, %v418_v29  ;;  %v599_v47 = vmul.f32 %v418_v29, %v418_v29  ;;  %v529_v50 = vsel %vm493_vm2, %v418_v29, 0.0  ;;  %v607_v48 = vmul.f32 %v1064_v30, %v1064_v30 }
  0xab   : > { %504 = vst.msk [vmem:[%s1036_s5 + $0x50] sm:$0xff] %vm493_vm2, %v1064_v30  ;;  %v530_v59 = vadd.f32 %v529_v50, %v528_v52 }
  0xac   : > { %519 = vst.msk [vmem:[%s1036_s5 + $0xc8] sm:$0xff] %vm493_vm2, %v1071_v31  ;;  %v632_v54 = vsel %vm493_vm2, %v599_v47, 0.0  ;;  %v543_v47 = vsel %vm493_vm2, %v1047_v26, 0.0 }
  0xad   : > { %v633_v2 = vadd.f32 %v632_v54, %v631_v58 }
  0xb0   : > { %v1079_v32 = vpop.f32.mrf.mxu2  ;;  %v1088_v35 = vpop.f32.mrf.mxu3 }
  0xb1   : > { %v420_v33 = vpop.f32.mrf.mxu0  ;;  %v1081_v34 = vpop.f32.mrf.mxu1  ;;  %512 = vst.msk [vmem:[%s1036_s5 + $0x90] sm:$0xff] %vm493_vm2, %v1079_v32 }
  0xb2   : > { %497 = vst.msk [vmem:[%s1036_s5 + $0x18] sm:$0xff] %vm493_vm2, %v420_v33  ;;  %v600_v51 = vmul.f32 %v420_v33, %v420_v33  ;;  %v531_v55 = vsel %vm493_vm2, %v420_v33, 0.0  ;;  %v541_v33 = vsel %vm493_vm2, %v1038_v23, 0.0  ;;  %v608_v52 = vmul.f32 %v1081_v34, %v1081_v34 }
  0xb3   : > { %505 = vst.msk [vmem:[%s1036_s5 + $0x58] sm:$0xff] %vm493_vm2, %v1081_v34  ;;  %v532_v3 = vadd.f32 %v531_v55, %v530_v59 }
  0xb4   : > { %520 = vst.msk [vmem:[%s1036_s5 + $0xd0] sm:$0xff] %vm493_vm2, %v1088_v35  ;;  %v634_v62 = vsel %vm493_vm2, %v600_v51, 0.0  ;;  %v545_v51 = vsel %vm493_vm2, %v1064_v30, 0.0 }
  0xb5   : > { %v635_v7 = vadd.f32 %v634_v62, %v633_v2  ;;  %v650_v62 = vsel %vm493_vm2, %v608_v52, 0.0 }
  0xb8   : > { %v1096_v36 = vpop.f32.mrf.mxu2  ;;  %v1105_v39 = vpop.f32.mrf.mxu3 }
  0xb9   : > { %v423_v37 = vpop.f32.mrf.mxu0  ;;  %v1098_v38 = vpop.f32.mrf.mxu1  ;;  %513 = vst.msk [vmem:[%s1036_s5 + $0x98] sm:$0xff] %vm493_vm2, %v1096_v36 }
  0xba   : > { %498 = vst.msk [vmem:[%s1036_s5 + $0x20] sm:$0xff] %vm493_vm2, %v423_v37  ;;  %v601_v56 = vmul.f32 %v423_v37, %v423_v37  ;;  %v533_v63 = vsel %vm493_vm2, %v423_v37, 0.0  ;;  %v606_v37 = vmul.f32 %v1047_v26, %v1047_v26  ;;  %v648_v26 = vsel %vm493_vm2, %v607_v48, 0.0 }
  0xbb   : > { %506 = vst.msk [vmem:[%s1036_s5 + $0x60] sm:$0xff] %vm493_vm2, %v1098_v38  ;;  %v534_v8 = vadd.f32 %v533_v63, %v532_v3  ;;  %v609_v58 = vmul.f32 %v1098_v38, %v1098_v38  ;;  %v549_v63 = vsel %vm493_vm2, %v1098_v38, 0.0 }
  0xbc   : > { %521 = vst.msk [vmem:[%s1036_s5 + $0xd8] sm:$0xff] %vm493_vm2, %v1105_v39  ;;  %v636_v4 = vsel %vm493_vm2, %v601_v56, 0.0  ;;  %v646_v50 = vsel %vm493_vm2, %v606_v37, 0.0  ;;  %v547_v56 = vsel %vm493_vm2, %v1081_v34, 0.0 }
  0xbd   : > { %v637_v11 = vadd.f32 %v636_v4, %v635_v7  ;;  %v652_v3 = vsel %vm493_vm2, %v609_v58, 0.0 }
  0xc0   : > { %v1113_v40 = vpop.f32.mrf.mxu2  ;;  %v1122_v44 = vpop.f32.mrf.mxu3 }
  0xc1   : > { %v425_v41 = vpop.f32.mrf.mxu0  ;;  %v1115_v42 = vpop.f32.mrf.mxu1  ;;  %514 = vst.msk [vmem:[%s1036_s5 + $0xa0] sm:$0xff] %vm493_vm2, %v1113_v40  ;;  %v617_v48 = vmul.f32 %v1113_v40, %v1113_v40 }
  0xc2   : > { %499 = vst.msk [vmem:[%s1036_s5 + $0x28] sm:$0xff] %vm493_vm2, %v425_v41  ;;  %v602_v0 = vmul.f32 %v425_v41, %v425_v41  ;;  %v535_v5 = vsel %vm493_vm2, %v425_v41, 0.0  ;;  %v551_v4 = vsel %vm493_vm2, %v1115_v42, 0.0 }
  0xc3   : > { %507 = vst.msk [vmem:[%s1036_s5 + $0x68] sm:$0xff] %vm493_vm2, %v1115_v42  ;;  %v536_v12 = vadd.f32 %v535_v5, %v534_v8 }
  0xc4   : > { %522 = vst.msk [vmem:[%s1036_s5 + $0xe0] sm:$0xff] %vm493_vm2, %v1122_v44  ;;  %v638_v9 = vsel %vm493_vm2, %v602_v0, 0.0  ;;  %v610_v0 = vmul.f32 %v1115_v42, %v1115_v42 }
  0xc5   : > { %v639_v15 = vadd.f32 %v638_v9, %v637_v11 }
  0xc6   : > { %v654_v8 = vsel %vm493_vm2, %v610_v0, 0.0  ;;  %v621_v0 = vmul.f32 %v1054_v27, %v1054_v27 }
  0xc8   : > { %v1137_v57 = vpop.f32.mrf.mxu2  ;;  %v1148_v1 = vpop.f32.mrf.mxu3 }
  0xc9   : > { %v428_v60 = vpop.f32.mrf.mxu0  ;;  %v1139_v61 = vpop.f32.mrf.mxu1  ;;  %515 = vst.msk [vmem:[%s1036_s5 + $0xa8] sm:$0xff] %vm493_vm2, %v1137_v57 }
  0xca   : > { %500 = vst.msk [vmem:[%s1036_s5 + $0x30] sm:$0xff] %vm493_vm2, %v428_v60  ;;  %v603_v6 = vmul.f32 %v428_v60, %v428_v60  ;;  %v537_v10 = vsel %vm493_vm2, %v428_v60, 0.0  ;;  %v611_v5 = vmul.f32 %v1139_v61, %v1139_v61  ;;  %v553_v38 = vsel %vm493_vm2, %v1139_v61, 0.0 }
  0xcb   : > { %508 = vst.msk [vmem:[%s1036_s5 + $0x70] sm:$0xff] %vm493_vm2, %v1139_v61  ;;  %v538_v16 = vadd.f32 %v537_v10, %v536_v12  ;;  %v613_v12 = vmul.f32 %v1045_v24, %v1045_v24 }
  0xcc   : > { %523 = vst.msk [vmem:[%s1036_s5 + $0xe8] sm:$0xff] %vm493_vm2, %v1148_v1  ;;  %v640_v13 = vsel %vm493_vm2, %v603_v6, 0.0 }
  0xcd   : > { %v641_v25 = vadd.f32 %v640_v13, %v639_v15  ;;  %v656_v13 = vsel %vm493_vm2, %v611_v5, 0.0 }
  0xd0   : > { %v1161_v14 = vpop.f32.mrf.mxu2  ;;  %v1171_v22 = vpop.f32.mrf.mxu3 }
  0xd1   : > { %v430_v17 = vpop.f32.mrf.mxu0  ;;  %v450_v18 = vpop.f32.mrf.mxu1  ;;  %516 = vst.msk [vmem:[%s1036_s5 + $0xb0] sm:$0xff] %vm493_vm2, %v1161_v14 }
  0xd2   : > { %501 = vst.msk [vmem:[%s1036_s5 + $0x38] sm:$0xff] %vm493_vm2, %v430_v17  ;;  %v539_v20 = vsel %vm493_vm2, %v430_v17, 0.0  ;;  %v604_v21 = vmul.f32 %v430_v17, %v430_v17  ;;  %v612_v9 = vmul.f32 %v450_v18, %v450_v18  ;;  %v555_v42 = vsel %vm493_vm2, %v450_v18, 0.0 }
  0xd3   : > { %v540_v29 = vadd.f32 %v539_v20, %v538_v16  ;;  %509 = vst.msk [vmem:[%s1036_s5 + $0x78] sm:$0xff] %vm493_vm2, %v450_v18  ;;  %v557_v17 = vsel %vm493_vm2, %v1045_v24, 0.0  ;;  %v615_v18 = vmul.f32 %v1079_v32, %v1079_v32  ;;  %v561_v24 = vsel %vm493_vm2, %v1079_v32, 0.0 }
  0xd4   : > { %v642_v41 = vsel %vm493_vm2, %v604_v21, 0.0  ;;  %524 = vst.msk [vmem:[%s1036_s5 + $0xf0] sm:$0xff] %vm493_vm2, %v1171_v22  ;;  %v658_v61 = vsel %vm493_vm2, %v612_v9, 0.0  ;;  %v565_v32 = vsel %vm493_vm2, %v1113_v40, 0.0  ;;  %v569_v40 = vsel %vm493_vm2, %v1161_v14, 0.0 }
  0xd5   : > { %v542_v43 = vadd.f32 %v541_v33, %v540_v29  ;;  %v643_v45 = vadd.f32 %v642_v41, %v641_v25  ;;  %v660_v25 = vsel %vm493_vm2, %v613_v12, 0.0  ;;  %v559_v29 = vsel %vm493_vm2, %v1062_v28, 0.0 }
  0xd6   : > { %v662_v41 = vsel %vm493_vm2, %v614_v19, 0.0  ;;  %v563_v28 = vsel %vm493_vm2, %v1096_v36, 0.0  ;;  %v624_v12 = vmul.f32 %v1105_v39, %v1105_v39 }
  0xd7   : > { %v544_v23 = vadd.f32 %v543_v47, %v542_v43  ;;  %v645_v49 = vadd.f32 %v644_v46, %v643_v45  ;;  %v616_v43 = vmul.f32 %v1096_v36, %v1096_v36  ;;  %v664_v47 = vsel %vm493_vm2, %v615_v18, 0.0 }
  0xd8   : > { %v1193_v53 = vpop.f32.mrf.mxu2  ;;  %v1203_v59 = vpop.f32.mrf.mxu3  ;;  %v567_v36 = vsel %vm493_vm2, %v1137_v57, 0.0  ;;  %v627_v18 = vmul.f32 %v1171_v22, %v1171_v22 }
  0xd9   : > { %v546_v54 = vadd.f32 %v545_v51, %v544_v23  ;;  %v647_v55 = vadd.f32 %v646_v50, %v645_v49  ;;  %517 = vst.msk [vmem:[%s1036_s5 + $0xb8] sm:$0xff] %vm493_vm2, %v1193_v53  ;;  %v666_v50 = vsel %vm493_vm2, %v616_v43, 0.0  ;;  %v618_v51 = vmul.f32 %v1137_v57, %v1137_v57 }
  0xda   : > { %525 = vst.msk [vmem:[%s1036_s5 + $0xf8] sm:$0xff] %vm493_vm2, %v1203_v59 }
  0xdb   : > { %v649_v30 = vadd.f32 %v648_v26, %v647_v55  ;;  %v548_v60 = vadd.f32 %v547_v56, %v546_v54  ;;  %v668_v55 = vsel %vm493_vm2, %v617_v48, 0.0  ;;  %v619_v26 = vmul.f32 %v1161_v14, %v1161_v14 }
  0xdc   : > { %v622_v14 = vmul.f32 %v1071_v31, %v1071_v31 }
  0xdd   : > { %v550_v2 = vadd.f32 %v549_v63, %v548_v60  ;;  %v651_v34 = vadd.f32 %v650_v62, %v649_v30  ;;  %v670_v30 = vsel %vm493_vm2, %v618_v51, 0.0  ;;  %v620_v60 = vmul.f32 %v1193_v53, %v1193_v53 }
  0xde   : > { %v672_v57 = vsel %vm493_vm2, %v619_v26, 0.0 }
  0xdf   : > { %v552_v6 = vadd.f32 %v551_v4, %v550_v2  ;;  %v653_v7 = vadd.f32 %v652_v3, %v651_v34  ;;  %v571_v2 = vsel %vm493_vm2, %v1193_v53, 0.0  ;;  %v573_v4 = vsel %vm493_vm2, %v1054_v27, 0.0 }
  0xe0   : > { %v674_v5 = vsel %vm493_vm2, %v620_v60, 0.0  ;;  %v623_v53 = vmul.f32 %v1088_v35, %v1088_v35  ;;  %v577_v27 = vsel %vm493_vm2, %v1088_v35, 0.0  ;;  %v581_v35 = vsel %vm493_vm2, %v1122_v44, 0.0 }
  0xe1   : > { %v554_v10 = vadd.f32 %v553_v38, %v552_v6  ;;  %v655_v11 = vadd.f32 %v654_v8, %v653_v7  ;;  %v676_v8 = vsel %vm493_vm2, %v621_v0, 0.0  ;;  %v575_v38 = vsel %vm493_vm2, %v1071_v31, 0.0 }
  0xe2   : > { %v579_v31 = vsel %vm493_vm2, %v1105_v39, 0.0  ;;  %v583_v39 = vsel %vm493_vm2, %v1148_v1, 0.0 }
  0xe3   : > { %v657_v15 = vadd.f32 %v656_v13, %v655_v11  ;;  %v556_v16 = vadd.f32 %v555_v42, %v554_v10  ;;  %v678_v11 = vsel %vm493_vm2, %v622_v14, 0.0 }
  0xe5   : > { %v558_v20 = vadd.f32 %v557_v17, %v556_v16  ;;  %v659_v21 = vadd.f32 %v658_v61, %v657_v15  ;;  %v680_v15 = vsel %vm493_vm2, %v623_v53, 0.0  ;;  %v625_v16 = vmul.f32 %v1122_v44, %v1122_v44 }
  0xe6   : > { %v682_v61 = vsel %vm493_vm2, %v624_v12, 0.0  ;;  %v585_v44 = vsel %vm493_vm2, %v1171_v22, 0.0 }
  0xe7   : > { %v560_v33 = vadd.f32 %v559_v29, %v558_v20  ;;  %v661_v37 = vadd.f32 %v660_v25, %v659_v21  ;;  %v626_v20 = vmul.f32 %v1148_v1, %v1148_v1  ;;  %v684_v29 = vsel %vm493_vm2, %v625_v16, 0.0 }
  0xe8   : > { %v587_v1 = vsel %vm493_vm2, %v1203_v59, 0.0 }
  0xe9   : > { %v562_v45 = vadd.f32 %v561_v24, %v560_v33  ;;  %v663_v46 = vadd.f32 %v662_v41, %v661_v37  ;;  %v686_v41 = vsel %vm493_vm2, %v626_v20, 0.0  ;;  %v628_v24 = vmul.f32 %v1203_v59, %v1203_v59 }
  0xeb   : > { %v665_v23 = vadd.f32 %v664_v47, %v663_v46  ;;  %v564_v49 = vadd.f32 %v563_v28, %v562_v45  ;;  %v688_v46 = vsel %vm493_vm2, %v627_v18, 0.0  ;;  %v690_v48 = vsel %vm493_vm2, %v628_v24, 0.0 }
  0xed   : > { %v566_v52 = vadd.f32 %v565_v32, %v564_v49  ;;  %v667_v54 = vadd.f32 %v666_v50, %v665_v23 }
  0xef   : > { %v568_v56 = vadd.f32 %v567_v36, %v566_v52  ;;  %v669_v58 = vadd.f32 %v668_v55, %v667_v54 }
  0xf1   : > { %v671_v62 = vadd.f32 %v670_v30, %v669_v58  ;;  %v570_v63 = vadd.f32 %v569_v40, %v568_v56 }
  0xf3   : > { %v673_v34 = vadd.f32 %v672_v57, %v671_v62  ;;  %v572_v3 = vadd.f32 %v571_v2, %v570_v63 }
  0xf5   : > { %v574_v6 = vadd.f32 %v573_v4, %v572_v3  ;;  %v675_v7 = vadd.f32 %v674_v5, %v673_v34 }
  0xf7   : > { %v576_v9 = vadd.f32 %v575_v38, %v574_v6  ;;  %v677_v10 = vadd.f32 %v676_v8, %v675_v7 }
  0xf9   : > { %v578_v13 = vadd.f32 %v577_v27, %v576_v9  ;;  %v679_v42 = vadd.f32 %v678_v11, %v677_v10 }
  0xfb   : > { %v681_v17 = vadd.f32 %v680_v15, %v679_v42  ;;  %v580_v19 = vadd.f32 %v579_v31, %v578_v13 }
  0xfd   : > { %v582_v21 = vadd.f32 %v581_v35, %v580_v19  ;;  %v683_v25 = vadd.f32 %v682_v61, %v681_v17 }
  0xff   : > { %v584_v33 = vadd.f32 %v583_v39, %v582_v21  ;;  %v685_v37 = vadd.f32 %v684_v29, %v683_v25 }
 0x101   : > { %v687_v43 = vadd.f32 %v686_v41, %v685_v37  ;;  %v586_v45 = vadd.f32 %v585_v44, %v584_v33 }
 0x103   : > { %v689_v47 = vadd.f32 %v688_v46, %v687_v43  ;;  %v588_v28 = vadd.f32 %v587_v1, %v586_v45 }
 0x105   : > { %v589_v23 = vrot.slane %v588_v28, 4  ;;  %v691_v49 = vadd.f32 %v690_v48, %v689_v47 }
 0x107   : > { %v590_v50 = vadd.f32 %v589_v23, %v588_v28  ;;  %v692_v22 = vrot.slane %v691_v49, 4 }
 0x109   : > { %v591_v32 = vrot.slane %v590_v50, 2  ;;  %v693_v51 = vadd.f32 %v692_v22, %v691_v49 }
 0x10b   : > { %v592_v52 = vadd.f32 %v591_v32, %v590_v50  ;;  %v694_v54 = vrot.slane %v693_v51, 2 }
 0x10d   : > { %v593_v55 = vrot.slane %v592_v52, 1  ;;  %v695_v36 = vadd.f32 %v694_v54, %v693_v51 }
 0x10f   : > { %v594_v59 = vadd.f32 %v593_v55, %v592_v52  ;;  %v696_v26 = vrot.slane %v695_v36, 1 }
 0x111   : > { %596 = vst.msk [vmem:[%s214_s8] sm:$0x1] %vm595_vm3, %v594_v59  ;;  %v697_v56 = vadd.f32 %v696_v26, %v695_v36 }
 0x113   : > { %698 = vst.msk [vmem:[%s217_s11] sm:$0x1] %vm595_vm3, %v697_v56 }
 0x114 PF: > { %s15_s15 = sadd.s32 1, %s945_s15  }
 0x115   : > { %p12_p5 = scmp.ge.s32.totalorder %s15_s15, 4  }
 0x117   :  { %14 = sbr.rel (!%p12_p5) target bundleno = 1 (0x1), region = 82 }

</bundles_post_ra>
